<compile_context>
chip_gen: v5e
topology: v5e:2x2
jax: 0.10.0
libtpu: 0.0.40
codegen_flags: <defaults>
</compile_context>

<pallas_src>
import jax
import jax.numpy as jnp
from jax.experimental import pallas as pl
from jax.experimental.pallas import tpu as pltpu


def _mlp_kernel(x_ref, w1_ref, b1_ref, wh_ref, bh_ref, w2_ref, b2_ref, out_ref):
    # h1 = tanh(x @ W1^T + b1)
    h = jnp.tanh(
        jnp.dot(x_ref[...], w1_ref[...], preferred_element_type=jnp.float32)
        + b1_ref[...]
    )
    # hidden stack: h = tanh(h @ Wh_d^T + bh_d), depth is static -> unrolled Python loop
    for d in range(wh_ref.shape[0]):
        h = jnp.tanh(
            jnp.dot(h, wh_ref[d], preferred_element_type=jnp.float32)
            + bh_ref[d]
        )
    # logits = h @ W2^T + b2   (output last dim padded to 128 multiple -> lane-dense store)
    out_ref[...] = (
        jnp.dot(h, w2_ref[...], preferred_element_type=jnp.float32) + b2_ref[...]
    )


def simple_crossword_forward(text, params):
    """text: int32 (B, input_size). Returns logits (B, output_size)."""
    C = params["embedding"]          # (V, E)
    W1, b1 = params["w1"], params["b1"]      # (H, E*I), (H,)
    Wh, bh = params["wh"], params["bh"]      # (D, H, H), (D, H)
    W2, b2 = params["w2"], params["b2"]      # (O, H), (O,)

    B, I = text.shape
    V, E = C.shape
    H = W1.shape[0]
    D = Wh.shape[0]
    O = W2.shape[0]
    K = E * I                                # W1.in_features

    # glue: embedding gather (data-dependent) + flatten, matching emb.view(-1, E*I) row-major order
    emb = jnp.take(C, text, axis=0).reshape(B, K).astype(jnp.float32)     # (B, K)

    # pad batch to sublane multiple (8) and output to lane multiple (128)
    Bp = ((B + 7) // 8) * 8
    Op = ((O + 127) // 128) * 128

    x_pad = jnp.zeros((Bp, K), jnp.float32).at[:B].set(emb)               # (Bp, K)
    w1_t = W1.T.astype(jnp.float32)                                       # (K, H)
    b1_r = b1.reshape(1, H).astype(jnp.float32)                           # (1, H)
    wh_t = jnp.transpose(Wh, (0, 2, 1)).astype(jnp.float32)               # (D, H, H)
    bh_r = bh.reshape(D, 1, H).astype(jnp.float32)                        # (D, 1, H)
    w2_t = jnp.zeros((H, Op), jnp.float32).at[:, :O].set(W2.T)            # (H, Op) zero-padded cols
    b2_r = jnp.zeros((1, Op), jnp.float32).at[:, :O].set(b2)              # (1, Op) zero-padded cols

    grid_spec = pltpu.PrefetchScalarGridSpec(
        num_scalar_prefetch=0,
        grid=(1,),
        in_specs=[
            pl.BlockSpec((Bp, K), lambda i: (0, 0)),        # x (padded batch)
            pl.BlockSpec((K, H), lambda i: (0, 0)),          # W1^T
            pl.BlockSpec((1, H), lambda i: (0, 0)),          # b1
            pl.BlockSpec((D, H, H), lambda i: (0, 0, 0)),    # hidden weights (stacked, transposed)
            pl.BlockSpec((D, 1, H), lambda i: (0, 0, 0)),    # hidden biases
            pl.BlockSpec((H, Op), lambda i: (0, 0)),         # W2^T (lane-padded)
            pl.BlockSpec((1, Op), lambda i: (0, 0)),         # b2 (lane-padded)
        ],
        out_specs=pl.BlockSpec((Bp, Op), lambda i: (0, 0)),  # logits (padded, lane-dense)
    )

    logits_pad = pl.pallas_call(
        _mlp_kernel,
        grid_spec=grid_spec,
        out_shape=jax.ShapeDtypeStruct((Bp, Op), jnp.float32),
        compiler_params=pltpu.CompilerParams(
            dimension_semantics=("arbitrary",),
        ),
    )(x_pad, w1_t, b1_r, wh_t, bh_r, w2_t, b2_r)

    return logits_pad[:B, :O]


def _reference_forward(text, params):
    """Pure-JAX reference matching the PyTorch forward."""
    C = params["embedding"]
    W1, b1 = params["w1"], params["b1"]
    Wh, bh = params["wh"], params["bh"]
    W2, b2 = params["w2"], params["b2"]
    B, I = text.shape
    E = C.shape[1]
    emb = jnp.take(C, text, axis=0).reshape(B, I * E).astype(jnp.float32)
    h = jnp.tanh(emb @ W1.T + b1)
    for d in range(Wh.shape[0]):
        h = jnp.tanh(h @ Wh[d].T + bh[d])
    return h @ W2.T + b2


def init_params(key, vocab_size, embed_dim, input_size, hidden_size, output_size,
                hidden_depth=1):
    ks = jax.random.split(key, 7)
    s = 0.1
    return {
        "embedding": s * jax.random.normal(ks[0], (vocab_size, embed_dim), jnp.float32),
        "w1": s * jax.random.normal(ks[1], (hidden_size, embed_dim * input_size), jnp.float32),
        "b1": s * jax.random.normal(ks[2], (hidden_size,), jnp.float32),
        "wh": s * jax.random.normal(ks[3], (hidden_depth, hidden_size, hidden_size), jnp.float32),
        "bh": s * jax.random.normal(ks[4], (hidden_depth, hidden_size), jnp.float32),
        "w2": s * jax.random.normal(ks[5], (output_size, hidden_size), jnp.float32),
        "b2": s * jax.random.normal(ks[6], (output_size,), jnp.float32),
    }


if __name__ == "__main__":
    # small shapes consistent with the module
    B = 2
    vocab_size, embed_dim, input_size = 40, 16, 8
    hidden_size, output_size, hidden_depth = 32, 40, 1

    key = jax.random.PRNGKey(0)
    pkey, tkey = jax.random.split(key)
    params = init_params(pkey, vocab_size, embed_dim, input_size,
                         hidden_size, output_size, hidden_depth)
    text = jax.random.randint(tkey, (B, input_size), 0, vocab_size, dtype=jnp.int32)

    logits = simple_crossword_forward(text, params)
    jax.block_until_ready(logits)

    ref = _reference_forward(text, params)
    assert logits.shape == (B, output_size)
    assert jnp.allclose(logits, ref, atol=1e-4, rtol=1e-4)

    print("KERNEL_OK")
</pallas_src>

<mosaic_0001>
module attributes {stable_mosaic.version = 11 : i64} {
  func.func @_mlp_kernel(%arg0: i32, %arg1: memref<8x128xf32, #tpu.memory_space<vmem>>, %arg2: memref<128x32xf32, #tpu.memory_space<vmem>>, %arg3: memref<1x32xf32, #tpu.memory_space<vmem>>, %arg4: memref<1x32x32xf32, #tpu.memory_space<vmem>>, %arg5: memref<1x1x32xf32, #tpu.memory_space<vmem>>, %arg6: memref<32x128xf32, #tpu.memory_space<vmem>>, %arg7: memref<1x128xf32, #tpu.memory_space<vmem>>, %arg8: memref<8x128xf32, #tpu.memory_space<vmem>>) attributes {dimension_semantics = [#tpu.dimension_semantics<arbitrary>], iteration_bounds = array<i64: 1>, scalar_prefetch = 0 : i64, scratch_operands = 0 : i64, tpu.core_type = #tpu.core_type<tc>, window_params = [{pipeline_mode = #tpu.pipeline_mode<synchronous>, transform_indices = @transform_0, window_bounds = array<i64: 8, 128>}, {pipeline_mode = #tpu.pipeline_mode<synchronous>, transform_indices = @transform_1, window_bounds = array<i64: 128, 32>}, {pipeline_mode = #tpu.pipeline_mode<synchronous>, transform_indices = @transform_2, window_bounds = array<i64: 1, 32>}, {pipeline_mode = #tpu.pipeline_mode<synchronous>, transform_indices = @transform_3, window_bounds = array<i64: 1, 32, 32>}, {pipeline_mode = #tpu.pipeline_mode<synchronous>, transform_indices = @transform_4, window_bounds = array<i64: 1, 1, 32>}, {pipeline_mode = #tpu.pipeline_mode<synchronous>, transform_indices = @transform_5, window_bounds = array<i64: 32, 128>}, {pipeline_mode = #tpu.pipeline_mode<synchronous>, transform_indices = @transform_6, window_bounds = array<i64: 1, 128>}, {pipeline_mode = #tpu.pipeline_mode<synchronous>, transform_indices = @transform_7, window_bounds = array<i64: 8, 128>}]} {
    %c0 = arith.constant 0 : index
    %c0_0 = arith.constant 0 : index
    %0 = vector.load %arg1[%c0, %c0_0] : memref<8x128xf32, #tpu.memory_space<vmem>>, vector<8x128xf32>
    %c0_1 = arith.constant 0 : index
    %c0_2 = arith.constant 0 : index
    %1 = vector.load %arg2[%c0_1, %c0_2] : memref<128x32xf32, #tpu.memory_space<vmem>>, vector<128x32xf32>
    %cst = arith.constant dense<0.000000e+00> : vector<8x32xf32>
    %2 = tpu.matmul %0, %1, %cst {dimension_numbers = #tpu.dot_dimension_numbers<[1], [0], [0], [1], [0, 0, 1, 1], [], []>} : vector<8x128xf32>, vector<128x32xf32>, vector<8x32xf32> -> vector<8x32xf32>
    %c0_3 = arith.constant 0 : index
    %c0_4 = arith.constant 0 : index
    %3 = vector.load %arg3[%c0_3, %c0_4] : memref<1x32xf32, #tpu.memory_space<vmem>>, vector<1x32xf32>
    %4 = vector.broadcast %3 : vector<1x32xf32> to vector<8x32xf32>
    %5 = arith.addf %2, %4 : vector<8x32xf32>
    %6 = math.tanh %5 : vector<8x32xf32>
    %c0_5 = arith.constant 0 : index
    %c0_6 = arith.constant 0 : index
    %c0_7 = arith.constant 0 : index
    %7 = vector.load %arg4[%c0_5, %c0_6, %c0_7] : memref<1x32x32xf32, #tpu.memory_space<vmem>>, vector<1x32x32xf32>
    %8 = vector.shape_cast %7 : vector<1x32x32xf32> to vector<32x32xf32>
    %cst_8 = arith.constant dense<0.000000e+00> : vector<8x32xf32>
    %9 = tpu.matmul %6, %8, %cst_8 {dimension_numbers = #tpu.dot_dimension_numbers<[1], [0], [0], [1], [0, 0, 1, 1], [], []>} : vector<8x32xf32>, vector<32x32xf32>, vector<8x32xf32> -> vector<8x32xf32>
    %c0_9 = arith.constant 0 : index
    %c0_10 = arith.constant 0 : index
    %c0_11 = arith.constant 0 : index
    %10 = vector.load %arg5[%c0_9, %c0_10, %c0_11] : memref<1x1x32xf32, #tpu.memory_space<vmem>>, vector<1x1x32xf32>
    %11 = vector.shape_cast %10 : vector<1x1x32xf32> to vector<1x32xf32>
    %12 = vector.broadcast %11 : vector<1x32xf32> to vector<8x32xf32>
    %13 = arith.addf %9, %12 : vector<8x32xf32>
    %14 = math.tanh %13 : vector<8x32xf32>
    %c0_12 = arith.constant 0 : index
    %c0_13 = arith.constant 0 : index
    %15 = vector.load %arg6[%c0_12, %c0_13] : memref<32x128xf32, #tpu.memory_space<vmem>>, vector<32x128xf32>
    %cst_14 = arith.constant dense<0.000000e+00> : vector<8x128xf32>
    %16 = tpu.matmul %14, %15, %cst_14 {dimension_numbers = #tpu.dot_dimension_numbers<[1], [0], [0], [1], [0, 0, 1, 1], [], []>} : vector<8x32xf32>, vector<32x128xf32>, vector<8x128xf32> -> vector<8x128xf32>
    %c0_15 = arith.constant 0 : index
    %c0_16 = arith.constant 0 : index
    %17 = vector.load %arg7[%c0_15, %c0_16] : memref<1x128xf32, #tpu.memory_space<vmem>>, vector<1x128xf32>
    %18 = vector.broadcast %17 : vector<1x128xf32> to vector<8x128xf32>
    %19 = arith.addf %16, %18 : vector<8x128xf32>
    %c0_17 = arith.constant 0 : index
    %c0_18 = arith.constant 0 : index
    %20 = vector.load %arg8[%c0_17, %c0_18] : memref<8x128xf32, #tpu.memory_space<vmem>>, vector<8x128xf32>
    tpu.vector_store %arg8[%c0_17, %c0_18], %19 {strides = array<i32>} : memref<8x128xf32, #tpu.memory_space<vmem>>, vector<8x128xf32>,
    return
  }
  func.func @transform_0(%arg0: i32) -> (i32, i32) {
    %c0_i32 = arith.constant 0 : i32
    %c0_i32_0 = arith.constant 0 : i32
    %c0_i32_1 = arith.constant 0 : i32
    return %c0_i32, %c0_i32_0 : i32, i32
  }
  func.func @transform_1(%arg0: i32) -> (i32, i32) {
    %c0_i32 = arith.constant 0 : i32
    %c0_i32_0 = arith.constant 0 : i32
    %c0_i32_1 = arith.constant 0 : i32
    return %c0_i32, %c0_i32_0 : i32, i32
  }
  func.func @transform_2(%arg0: i32) -> (i32, i32) {
    %c0_i32 = arith.constant 0 : i32
    %c0_i32_0 = arith.constant 0 : i32
    %c0_i32_1 = arith.constant 0 : i32
    return %c0_i32, %c0_i32_0 : i32, i32
  }
  func.func @transform_3(%arg0: i32) -> (i32, i32, i32) {
    %c0_i32 = arith.constant 0 : i32
    %c0_i32_0 = arith.constant 0 : i32
    %c0_i32_1 = arith.constant 0 : i32
    %c0_i32_2 = arith.constant 0 : i32
    return %c0_i32, %c0_i32_0, %c0_i32_1 : i32, i32, i32
  }
  func.func @transform_4(%arg0: i32) -> (i32, i32, i32) {
    %c0_i32 = arith.constant 0 : i32
    %c0_i32_0 = arith.constant 0 : i32
    %c0_i32_1 = arith.constant 0 : i32
    %c0_i32_2 = arith.constant 0 : i32
    return %c0_i32, %c0_i32_0, %c0_i32_1 : i32, i32, i32
  }
  func.func @transform_5(%arg0: i32) -> (i32, i32) {
    %c0_i32 = arith.constant 0 : i32
    %c0_i32_0 = arith.constant 0 : i32
    %c0_i32_1 = arith.constant 0 : i32
    return %c0_i32, %c0_i32_0 : i32, i32
  }
  func.func @transform_6(%arg0: i32) -> (i32, i32) {
    %c0_i32 = arith.constant 0 : i32
    %c0_i32_0 = arith.constant 0 : i32
    %c0_i32_1 = arith.constant 0 : i32
    return %c0_i32, %c0_i32_0 : i32, i32
  }
  func.func @transform_7(%arg0: i32) -> (i32, i32) {
    %c0_i32 = arith.constant 0 : i32
    %c0_i32_0 = arith.constant 0 : i32
    %c0_i32_1 = arith.constant 0 : i32
    return %c0_i32, %c0_i32_0 : i32, i32
  }
}

</mosaic_0001>

<bundles_post_ra>
// kernel: tpu_custom_call.1
= control target key start
LH: loop header
LB: loop body
LE: loop exit
PB: predicated region body
PF: predicated region fallthrough
CT: control target
= control target key end

     0   :  { %s316_s0 = inlined_call_operand.vmem [shape: f32[8,128], index: 0, kind: input, shape index: {}]   ;;  %s317_s1 = inlined_call_operand.vmem [shape: f32[128,32], index: 1, kind: input, shape index: {}]   ;;  %s318_s2 = inlined_call_operand.vmem [shape: f32[1,32], index: 2, kind: input, shape index: {}]   ;;  %s319_s3 = inlined_call_operand.vmem [shape: f32[1,32,32], index: 3, kind: input, shape index: {}]   ;;  %s320_s4 = inlined_call_operand.vmem [shape: f32[1,1,32], index: 4, kind: input, shape index: {}]   ;;  %s321_s5 = inlined_call_operand.vmem [shape: f32[32,128], index: 5, kind: input, shape index: {}]   ;;  %s322_s6 = inlined_call_operand.vmem [shape: f32[1,128], index: 6, kind: input, shape index: {}]   ;;  %s323_s7 = inlined_call_operand.hbm [shape: f32[8,128], index: 7, kind: output, shape index: {}]  }
   0x1   :  { %v43_v0 = vld [vmem:[%s317_s1 + $0x78] sm:$0xff]  ;;  %v42_v1 = vld [vmem:[%s317_s1 + $0x70] sm:$0xff]  ;;  %v41_v2 = vld [vmem:[%s317_s1 + $0x68] sm:$0xff] }
   0x2   :  { %48 = vmatpush.msra.mxu0 %v43_v0  ;;  %v40_v3 = vld [vmem:[%s317_s1 + $0x60] sm:$0xff]  ;;  %v39_v4 = vld [vmem:[%s317_s1 + $0x58] sm:$0xff] }
   0x4   :  { %49 = vmatpush.msra.mxu0 %v42_v1 }
   0x6   :  { %50 = vmatpush.msra.mxu0 %v41_v2 }
   0x8   :  { %51 = vmatpush.msra.mxu0 %v40_v3 }
   0x9   :  { %12 = vsyncpa [#allocation3], 0  ;;  %v38_v5 = vld [vmem:[%s317_s1 + $0x50] sm:$0xff]  ;;  %v37_v6 = vld [vmem:[%s317_s1 + $0x48] sm:$0xff]  ;;  %vm77_vm0 = vcmask 261120   ;;  %s186_s30 = smov [#allocation2]  }
   0xa   :  { %52 = vmatpush.msra.mxu0 %v39_v4  ;;  %v36_v7 = vld [vmem:[%s317_s1 + $0x40] sm:$0xff]  ;;  %v35_v8 = vld [vmem:[%s317_s1 + $0x38] sm:$0xff]  ;;  %v34_v9 = vld [vmem:[%s317_s1 + $0x30] sm:$0xff]  ;;  %s139_s8 = sshll.u32 %s186_s30, 4  ;;  %s141_s10 = sshll.u32 %s323_s7, 4  ;;  %s140_s8 = int_to_ptr.vmem [resolvable:$true] %s139_s8  ;;  %s142_s10 = int_to_ptr.hbm [resolvable:$true] %s141_s10 }
   0xb   :  { %v33_v10 = vld [vmem:[%s317_s1 + $0x28] sm:$0xff]  ;;  %v32_v11 = vld [vmem:[%s317_s1 + $0x20] sm:$0xff]  ;;  %v31_v12 = vld [vmem:[%s317_s1 + $0x18] sm:$0xff] }
   0xc   :  { %53 = vmatpush.msra.mxu0 %v38_v5  ;;  %v30_v13 = vld [vmem:[%s317_s1 + $0x10] sm:$0xff]  ;;  %v29_v14 = vld [vmem:[%s317_s1 + $0x8] sm:$0xff]  ;;  %v28_v15 = vld [vmem:[%s317_s1] sm:$0xff] }
   0xd   :  { %v27_v16 = vld [vmem:[%s316_s0] sm:$0xff]  ;;  %v72_v17 = vld [vmem:[%s319_s3 + $0x18] sm:$0xff]  ;;  %v71_v18 = vld [vmem:[%s319_s3 + $0x10] sm:$0xff] }
   0xe   :  { %54 = vmatpush.msra.mxu0 %v37_v6  ;;  %93 = vmatpush.msra.mxu1 %v72_v17  ;;  %v70_v19 = vld [vmem:[%s319_s3 + $0x8] sm:$0xff]  ;;  %v69_v20 = vld [vmem:[%s319_s3] sm:$0xff]  ;;  %v105_v25 = vld [vmem:[%s321_s5 + $0x18] sm:$0xff] }
   0xf   :  { %v153_v21 = vld [vmem:[%s318_s2] ss:$0 sm:$0xff]  ;;  %125 = vmatpush.msra.mxu2 %v105_v25  ;;  %v104_v26 = vld [vmem:[%s321_s5 + $0x10] sm:$0xff]  ;;  %v103_v27 = vld [vmem:[%s321_s5 + $0x8] sm:$0xff] }
  0x10   :  { %55 = vmatpush.msra.mxu0 %v36_v7  ;;  %94 = vmatpush.msra.mxu1 %v71_v18  ;;  %v102_v28 = vld [vmem:[%s321_s5] sm:$0xff] }
  0x11   :  { %126 = vmatpush.msra.mxu2 %v104_v26  ;;  %v154_v29 = vld [vmem:[%s320_s4] ss:$0 sm:$0xff] }
  0x12   :  { %56 = vmatpush.msra.mxu0 %v35_v8  ;;  %95 = vmatpush.msra.mxu1 %v70_v19  ;;  %v155_v33 = vld [vmem:[%s322_s6] ss:$0 sm:$0xff] }
  0x13   :  { %127 = vmatpush.msra.mxu2 %v103_v27 }
  0x14   :  { %57 = vmatpush.msra.mxu0 %v34_v9  ;;  %96 = vmatpush.msra.mxu1 %v69_v20 }
  0x15   :  { %128 = vmatpush.msra.mxu2 %v102_v28 }
  0x16   :  { %58 = vmatpush.msra.mxu0 %v33_v10 }
  0x18   :  { %59 = vmatpush.msra.mxu0 %v32_v11 }
  0x1a   :  { %60 = vmatpush.msra.mxu0 %v31_v12 }
  0x1c   :  { %61 = vmatpush.msra.mxu0 %v30_v13 }
  0x1e   :  { %62 = vmatpush.msra.mxu0 %v29_v14 }
  0x20   :  { %63 = vmatpush.msra.mxu0 %v28_v15 }
  0x21   :  { %64 = vmatmul.f32.vlgmr.msra.gmra.mxu0 %v27_v16 }
  0x9e   :  { %v65_v22 = vpop.f32.mrf.mxu0 }
  0x9f   :  { %v66_v23 = vadd.f32 %v153_v21, %v65_v22 }
  0xa1   :  { %156 = vtanh.f32 %v66_v23 }
  0xa7   :  { %v157_v24 = vpop.eup %156 }
  0xa8   :  { %150 = vmatmul.msk.f32.vlgmr.msra.gmra.mxu1 %vm77_vm0, %v157_v24 }
 0x125   :  { %v98_v30 = vpop.f32.mrf.mxu1 }
 0x126   :  { %v99_v31 = vadd.f32 %v154_v29, %v98_v30 }
 0x128   :  { %158 = vtanh.f32 %v99_v31 }
 0x12e   :  { %v159_v32 = vpop.eup %158 }
 0x12f   :  { %151 = vmatmul.msk.f32.vlgmr.msra.gmra.mxu2 %vm77_vm0, %v159_v32 }
 0x1b2   :  { %v130_v34 = vpop.f32.mrf.mxu2 }
 0x1b3   :  { %v131_v35 = vadd.f32 %v155_v33, %v130_v34 }
 0x1b5   :  { %133 = vst [vmem:[#allocation2] sm:$0xff] %v131_v35 }
 0x1b6   :  { %144 = dma.vmem_to_hbm [thread:$0]  %s140_s8, 128, %s142_s10, [#allocation3]  }
 0x1b7   :  { %184 = dma.done.wait [#allocation3], 128  }
 0x1b8   :  { %185 = vsyncadd [#allocation3], 4294967168 }
 0x1b9   :  { %149 = vsyncpa [#allocation3], 1 }

</bundles_post_ra>
